<compile_context>
chip_gen: v7x
topology: tpu7x:2x2x1
jax: 0.10.0
libtpu: 0.0.40
codegen_flags: <defaults>
</compile_context>

<pallas_src>
import math

import jax
import jax.numpy as jnp
from jax import lax
from jax.experimental import pallas as pl
from jax.experimental.pallas import tpu as pltpu


def _round_up(x, m):
  return ((x + m - 1) // m) * m


def attn_decoder_kernel(
    word_smem_ref,                       # (1,) int32 in SMEM — only used by index_maps
    emb_ref, ctx_ref, h_ref, enc_ref,
    we_r_ref, we_z_ref, we_n_ref,
    wc_r_ref, wc_z_ref, wc_n_ref,
    wh_r_ref, wh_z_ref, wh_n_ref,
    b_r_ref, b_z_ref, b_in_ref, b_hn_ref,
    w_attn_ref, b_attn_ref,
    w_out_h_ref, w_out_c_ref, b_out_ref,
    out_ref,
):
  del word_smem_ref  # embedding row already gathered via the BlockSpec index_map
  f32, bf16 = jnp.float32, jnp.bfloat16
  H = h_ref.shape[1]
  V = b_out_ref.shape[1]
  S = enc_ref.shape[0]

  def mm(a, w_ref):
    # bf16 x bf16 on the MXU, f32 accumulation; never upcast the weight tile.
    return jnp.dot(a.astype(bf16), w_ref[...], preferred_element_type=f32)

  emb = emb_ref[0]                       # (1, H) bf16 — the gathered embedding row
  ctx = ctx_ref[...]                     # (1, H) f32   last_context
  h_prev = h_ref[...]                    # (1, H) f32   last_hidden (n_layers = 1)
  enc = enc_ref[...]                     # (S, H) bf16  encoder_outputs

  # --- GRU cell (single layer, single step), PyTorch gate order r/z/n ---------------
  r = jax.nn.sigmoid(mm(emb, we_r_ref) + mm(ctx, wc_r_ref)
                     + mm(h_prev, wh_r_ref) + b_r_ref[...])
  z = jax.nn.sigmoid(mm(emb, we_z_ref) + mm(ctx, wc_z_ref)
                     + mm(h_prev, wh_z_ref) + b_z_ref[...])
  n = jnp.tanh(mm(emb, we_n_ref) + mm(ctx, wc_n_ref) + b_in_ref[...]
               + r * (mm(h_prev, wh_n_ref) + b_hn_ref[...]))
  h_new = (1.0 - z) * n + z * h_prev                                   # (1, H) f32

  # --- Attention 'general': score_s = <h_new @ W_attn, enc_s> + <h_new, b_attn> -----
  u = mm(h_new, w_attn_ref)                                            # (1, H) f32
  bias_s = jnp.sum(h_new * b_attn_ref[...], axis=1, keepdims=True)     # (1, 1) f32
  scores = lax.dot_general(u.astype(bf16), enc,
                           (((1,), (1,)), ((), ())),
                           preferred_element_type=f32) + bias_s        # (1, S) f32
  m = jnp.max(scores, axis=1, keepdims=True)
  e = jnp.exp(scores - m)
  attn_w = e / jnp.sum(e, axis=1, keepdims=True)   # exact division: returned output

  # context = attn_weights @ encoder_outputs
  context = jnp.dot(attn_w.astype(bf16), enc, preferred_element_type=f32)  # (1, H)

  # output = log_softmax(out(cat(rnn_output, context))), concat pre-split host-side
  logits = mm(h_new, w_out_h_ref) + mm(context, w_out_c_ref) + b_out_ref[...]  # (1, V)
  lm = jnp.max(logits, axis=1, keepdims=True)
  lse = jnp.log(jnp.sum(jnp.exp(logits - lm), axis=1, keepdims=True)) + lm
  log_probs = logits - lse

  # --- Lane-aligned packed output slab (each segment starts on a 128-lane boundary) -
  off_ctx = _round_up(V, 128)
  off_h = off_ctx + _round_up(H, 128)
  off_attn = off_h + _round_up(H, 128)
  out_ref[:, 0:V] = log_probs
  out_ref[:, off_ctx:off_ctx + H] = context
  out_ref[:, off_h:off_h + H] = h_new
  out_ref[:, off_attn:off_attn + S] = attn_w


def attn_decoder_forward(params, word_input, last_context, last_hidden,
                         encoder_outputs):
  H = params["hidden_size"]
  V = params["output_size"]
  S = encoder_outputs.shape[0]
  off_ctx = _round_up(V, 128)
  off_h = off_ctx + _round_up(H, 128)
  off_attn = off_h + _round_up(H, 128)
  slab_w = off_attn + _round_up(S, 128)

  # host-side glue: reshape / dtype normalisation only
  word = jnp.clip(jnp.asarray(word_input, jnp.int32).reshape(1), 0, V - 1)
  ctx = last_context.reshape(1, H).astype(jnp.float32)
  h0 = last_hidden.reshape(1, H).astype(jnp.float32)          # n_layers = 1
  enc = encoder_outputs.reshape(S, H).astype(jnp.bfloat16)    # MXU operand -> bf16

  args = (params["embedding"], ctx, h0, enc,
          params["we_r"], params["we_z"], params["we_n"],
          params["wc_r"], params["wc_z"], params["wc_n"],
          params["wh_r"], params["wh_z"], params["wh_n"],
          params["b_r"], params["b_z"], params["b_in"], params["b_hn"],
          params["w_attn_g"], params["b_attn"],
          params["w_out_h"], params["w_out_c"], params["b_out"])

  # Embedding: DMA only the selected (1, 1, H) row (token id comes from the SMEM
  # scalar-prefetch operand and drives the index_map).
  emb_spec = pl.BlockSpec((1, 1, H), lambda i, word_ref: (word_ref[0], 0, 0))
  full2d = lambda a: pl.BlockSpec(a.shape, lambda i, word_ref: (0, 0))
  in_specs = [emb_spec] + [full2d(a) for a in args[1:]]

  slab = pl.pallas_call(
      attn_decoder_kernel,
      out_shape=jax.ShapeDtypeStruct((1, slab_w), jnp.float32),
      grid_spec=pltpu.PrefetchScalarGridSpec(
          num_scalar_prefetch=1,
          grid=(1,),
          in_specs=in_specs,
          out_specs=pl.BlockSpec((1, slab_w), lambda i, word_ref: (0, 0)),
      ),
      compiler_params=pltpu.CompilerParams(dimension_semantics=("arbitrary",)),
  )(word, *args)

  output = slab[:, 0:V]                                      # (1, V) log-probs
  context = slab[:, off_ctx:off_ctx + H]                     # (1, H)
  hidden = slab[:, off_h:off_h + H].reshape(1, 1, H)         # (n_layers, 1, H)
  attn_w = slab[:, off_attn:off_attn + S].reshape(1, 1, S)   # (1, 1, S)
  return output, context, hidden, attn_w


def init_params(key, hidden_size, output_size, weights_dtype=jnp.bfloat16):
  """Torch-style init, then pre-split / pre-transpose / bf16-cast for the kernel."""
  H, V = hidden_size, output_size
  ks = jax.random.split(key, 9)
  u = lambda k, shape, b: jax.random.uniform(k, shape, jnp.float32, -b, b)
  k_gru = 1.0 / math.sqrt(H)
  k_out = 1.0 / math.sqrt(2 * H)

  embedding = jax.random.normal(ks[0], (V, H), jnp.float32)   # nn.Embedding default
  w_ih = u(ks[1], (3 * H, 2 * H), k_gru)                      # GRU weight_ih_l0
  w_hh = u(ks[2], (3 * H, H), k_gru)                          # GRU weight_hh_l0
  b_ih = u(ks[3], (3 * H,), k_gru)
  b_hh = u(ks[4], (3 * H,), k_gru)
  w_attn = u(ks[5], (H, H), k_gru)                            # Attn 'general' Linear
  b_attn = u(ks[6], (1, H), k_gru)
  w_out = u(ks[7], (V, 2 * H), k_out)                         # out Linear
  b_out = u(ks[8], (1, V), k_out)

  wd = weights_dtype
  gate = lambda w, g: w[g * H:(g + 1) * H, :]                 # rows of gate g (r=0,z=1,n=2)

  return dict(
      hidden_size=H, output_size=V,
      # (V, 1, H) so one row is fetched with a (1, 1, H) BlockSpec gather; bf16 storage.
      embedding=embedding.reshape(V, 1, H).astype(wd),
      # input-hidden weights split per gate and per source (embedding | context), pre-T
      we_r=gate(w_ih, 0)[:, :H].T.astype(wd), wc_r=gate(w_ih, 0)[:, H:].T.astype(wd),
      we_z=gate(w_ih, 1)[:, :H].T.astype(wd), wc_z=gate(w_ih, 1)[:, H:].T.astype(wd),
      we_n=gate(w_ih, 2)[:, :H].T.astype(wd), wc_n=gate(w_ih, 2)[:, H:].T.astype(wd),
      # hidden-hidden weights per gate, pre-transposed
      wh_r=gate(w_hh, 0).T.astype(wd),
      wh_z=gate(w_hh, 1).T.astype(wd),
      wh_n=gate(w_hh, 2).T.astype(wd),
      # biases (f32): r/z input+hidden biases folded; n kept separate (PyTorch GRU)
      b_r=(b_ih[0:H] + b_hh[0:H]).reshape(1, H),
      b_z=(b_ih[H:2 * H] + b_hh[H:2 * H]).reshape(1, H),
      b_in=b_ih[2 * H:].reshape(1, H),
      b_hn=b_hh[2 * H:].reshape(1, H),
      # attention weight kept in torch (out,in) orientation: kernel does u = h @ W
      w_attn_g=w_attn.astype(wd), b_attn=b_attn,
      # output projection split into h / context halves, pre-transposed
      w_out_h=w_out[:, :H].T.astype(wd), w_out_c=w_out[:, H:].T.astype(wd),
      b_out=b_out,
  )


def _reference_forward(params, word_input, last_context, last_hidden,
                       encoder_outputs):
  """Pure-f32 JAX reference mirroring the PyTorch forward (original 'general'
  attention formulation), on the same bf16-stored weights."""
  H = params["hidden_size"]
  S = encoder_outputs.shape[0]
  up = lambda w: w.astype(jnp.float32)

  emb = up(params["embedding"]).reshape(-1, H)[word_input].reshape(1, H)
  ctx = last_context.reshape(1, H).astype(jnp.float32)
  h = last_hidden.reshape(1, H).astype(jnp.float32)
  enc = encoder_outputs.reshape(S, H).astype(jnp.float32)

  r = jax.nn.sigmoid(emb @ up(params["we_r"]) + ctx @ up(params["wc_r"])
                     + h @ up(params["wh_r"]) + params["b_r"])
  z = jax.nn.sigmoid(emb @ up(params["we_z"]) + ctx @ up(params["wc_z"])
                     + h @ up(params["wh_z"]) + params["b_z"])
  n = jnp.tanh(emb @ up(params["we_n"]) + ctx @ up(params["wc_n"]) + params["b_in"]
               + r * (h @ up(params["wh_n"]) + params["b_hn"]))
  h_new = (1.0 - z) * n + z * h

  energies = enc @ up(params["w_attn_g"]).T + params["b_attn"]   # nn.Linear(enc_i)
  scores = h_new @ energies.T
  w = jax.nn.softmax(scores, axis=1)
  context = w @ enc
  logits = (h_new @ up(params["w_out_h"]) + context @ up(params["w_out_c"])
            + params["b_out"])
  return jax.nn.log_softmax(logits, axis=1), context, h_new, w


if __name__ == "__main__":
  HIDDEN = 32      # hidden_size
  VOCAB = 64       # output_size
  SEQ = 8          # encoder sequence length
  key = jax.random.PRNGKey(0)
  kp, k1, k2, k3 = jax.random.split(key, 4)

  params = init_params(kp, HIDDEN, VOCAB)

  word_input = jnp.array(5, dtype=jnp.int32)                          # current token id
  last_context = jax.random.normal(k1, (1, HIDDEN), jnp.float32)      # (1, H)
  last_hidden = jax.random.normal(k2, (1, 1, HIDDEN), jnp.float32)    # (n_layers, 1, H)
  encoder_outputs = jax.random.normal(k3, (SEQ, 1, HIDDEN), jnp.float32)  # (S, 1, H)

  output, context, hidden, attn_weights = attn_decoder_forward(
      params, word_input, last_context, last_hidden, encoder_outputs)
  jax.block_until_ready((output, context, hidden, attn_weights))

  # Compare against a pure-f32 reference: the kernel feeds bf16 operands to the MXU
  # (weights AND activations), so tolerances account for bf16 activation rounding.
  ro, rc, rh, rw = _reference_forward(params, word_input, last_context,
                                      last_hidden, encoder_outputs)
  assert output.shape == (1, VOCAB)
  assert context.shape == (1, HIDDEN)
  assert hidden.shape == (1, 1, HIDDEN)
  assert attn_weights.shape == (1, 1, SEQ)
  tol = dict(atol=4e-2, rtol=4e-2)
  assert jnp.allclose(output, ro, **tol)
  assert jnp.allclose(context, rc, **tol)
  assert jnp.allclose(hidden.reshape(1, HIDDEN), rh, **tol)
  assert jnp.allclose(attn_weights.reshape(1, SEQ), rw, **tol)

  print("KERNEL_OK")
</pallas_src>

<mosaic_0001>
module attributes {stable_mosaic.version = 11 : i64} {
  func.func @attn_decoder_kernel(%arg0: i32, %arg1: memref<1xi32, #tpu.memory_space<smem>>, %arg2: memref<1x1x32xbf16, #tpu.memory_space<vmem>>, %arg3: memref<1x32xf32, #tpu.memory_space<vmem>>, %arg4: memref<1x32xf32, #tpu.memory_space<vmem>>, %arg5: memref<8x32xbf16, #tpu.memory_space<vmem>>, %arg6: memref<32x32xbf16, #tpu.memory_space<vmem>>, %arg7: memref<32x32xbf16, #tpu.memory_space<vmem>>, %arg8: memref<32x32xbf16, #tpu.memory_space<vmem>>, %arg9: memref<32x32xbf16, #tpu.memory_space<vmem>>, %arg10: memref<32x32xbf16, #tpu.memory_space<vmem>>, %arg11: memref<32x32xbf16, #tpu.memory_space<vmem>>, %arg12: memref<32x32xbf16, #tpu.memory_space<vmem>>, %arg13: memref<32x32xbf16, #tpu.memory_space<vmem>>, %arg14: memref<32x32xbf16, #tpu.memory_space<vmem>>, %arg15: memref<1x32xf32, #tpu.memory_space<vmem>>, %arg16: memref<1x32xf32, #tpu.memory_space<vmem>>, %arg17: memref<1x32xf32, #tpu.memory_space<vmem>>, %arg18: memref<1x32xf32, #tpu.memory_space<vmem>>, %arg19: memref<32x32xbf16, #tpu.memory_space<vmem>>, %arg20: memref<1x32xf32, #tpu.memory_space<vmem>>, %arg21: memref<32x64xbf16, #tpu.memory_space<vmem>>, %arg22: memref<32x64xbf16, #tpu.memory_space<vmem>>, %arg23: memref<1x64xf32, #tpu.memory_space<vmem>>, %arg24: memref<1x512xf32, #tpu.memory_space<vmem>>) attributes {dimension_semantics = [#tpu.dimension_semantics<arbitrary>], iteration_bounds = array<i64: 1>, scalar_prefetch = 1 : i64, scratch_operands = 0 : i64, tpu.core_type = #tpu.core_type<tc>, window_params = [{transform_indices = @transform_0, window_bounds = array<i64: 1, 1, 32>}, {pipeline_mode = #tpu.pipeline_mode<synchronous>, transform_indices = @transform_1, window_bounds = array<i64: 1, 32>}, {pipeline_mode = #tpu.pipeline_mode<synchronous>, transform_indices = @transform_2, window_bounds = array<i64: 1, 32>}, {pipeline_mode = #tpu.pipeline_mode<synchronous>, transform_indices = @transform_3, window_bounds = array<i64: 8, 32>}, {pipeline_mode = #tpu.pipeline_mode<synchronous>, transform_indices = @transform_4, window_bounds = array<i64: 32, 32>}, {pipeline_mode = #tpu.pipeline_mode<synchronous>, transform_indices = @transform_5, window_bounds = array<i64: 32, 32>}, {pipeline_mode = #tpu.pipeline_mode<synchronous>, transform_indices = @transform_6, window_bounds = array<i64: 32, 32>}, {pipeline_mode = #tpu.pipeline_mode<synchronous>, transform_indices = @transform_7, window_bounds = array<i64: 32, 32>}, {pipeline_mode = #tpu.pipeline_mode<synchronous>, transform_indices = @transform_8, window_bounds = array<i64: 32, 32>}, {pipeline_mode = #tpu.pipeline_mode<synchronous>, transform_indices = @transform_9, window_bounds = array<i64: 32, 32>}, {pipeline_mode = #tpu.pipeline_mode<synchronous>, transform_indices = @transform_10, window_bounds = array<i64: 32, 32>}, {pipeline_mode = #tpu.pipeline_mode<synchronous>, transform_indices = @transform_11, window_bounds = array<i64: 32, 32>}, {pipeline_mode = #tpu.pipeline_mode<synchronous>, transform_indices = @transform_12, window_bounds = array<i64: 32, 32>}, {pipeline_mode = #tpu.pipeline_mode<synchronous>, transform_indices = @transform_13, window_bounds = array<i64: 1, 32>}, {pipeline_mode = #tpu.pipeline_mode<synchronous>, transform_indices = @transform_14, window_bounds = array<i64: 1, 32>}, {pipeline_mode = #tpu.pipeline_mode<synchronous>, transform_indices = @transform_15, window_bounds = array<i64: 1, 32>}, {pipeline_mode = #tpu.pipeline_mode<synchronous>, transform_indices = @transform_16, window_bounds = array<i64: 1, 32>}, {pipeline_mode = #tpu.pipeline_mode<synchronous>, transform_indices = @transform_17, window_bounds = array<i64: 32, 32>}, {pipeline_mode = #tpu.pipeline_mode<synchronous>, transform_indices = @transform_18, window_bounds = array<i64: 1, 32>}, {pipeline_mode = #tpu.pipeline_mode<synchronous>, transform_indices = @transform_19, window_bounds = array<i64: 32, 64>}, {pipeline_mode = #tpu.pipeline_mode<synchronous>, transform_indices = @transform_20, window_bounds = array<i64: 32, 64>}, {pipeline_mode = #tpu.pipeline_mode<synchronous>, transform_indices = @transform_21, window_bounds = array<i64: 1, 64>}, {pipeline_mode = #tpu.pipeline_mode<synchronous>, transform_indices = @transform_22, window_bounds = array<i64: 1, 512>}]} {
    %c0 = arith.constant 0 : index
    %c0_0 = arith.constant 0 : index
    %c0_1 = arith.constant 0 : index
    %0 = vector.load %arg2[%c0, %c0_0, %c0_1] : memref<1x1x32xbf16, #tpu.memory_space<vmem>>, vector<1x1x32xbf16>
    %1 = vector.shape_cast %0 : vector<1x1x32xbf16> to vector<1x32xbf16>
    %c0_2 = arith.constant 0 : index
    %c0_3 = arith.constant 0 : index
    %2 = vector.load %arg3[%c0_2, %c0_3] : memref<1x32xf32, #tpu.memory_space<vmem>>, vector<1x32xf32>
    %c0_4 = arith.constant 0 : index
    %c0_5 = arith.constant 0 : index
    %3 = vector.load %arg4[%c0_4, %c0_5] : memref<1x32xf32, #tpu.memory_space<vmem>>, vector<1x32xf32>
    %c0_6 = arith.constant 0 : index
    %c0_7 = arith.constant 0 : index
    %4 = vector.load %arg5[%c0_6, %c0_7] : memref<8x32xbf16, #tpu.memory_space<vmem>>, vector<8x32xbf16>
    %c0_8 = arith.constant 0 : index
    %c0_9 = arith.constant 0 : index
    %5 = vector.load %arg6[%c0_8, %c0_9] : memref<32x32xbf16, #tpu.memory_space<vmem>>, vector<32x32xbf16>
    %cst = arith.constant dense<0.000000e+00> : vector<1x32xf32>
    %6 = tpu.matmul %1, %5, %cst {dimension_numbers = #tpu.dot_dimension_numbers<[1], [0], [0], [1], [0, 0, 1, 1], [], []>} : vector<1x32xbf16>, vector<32x32xbf16>, vector<1x32xf32> -> vector<1x32xf32>
    %7 = arith.truncf %2 : vector<1x32xf32> to vector<1x32xbf16>
    %c0_10 = arith.constant 0 : index
    %c0_11 = arith.constant 0 : index
    %8 = vector.load %arg9[%c0_10, %c0_11] : memref<32x32xbf16, #tpu.memory_space<vmem>>, vector<32x32xbf16>
    %cst_12 = arith.constant dense<0.000000e+00> : vector<1x32xf32>
    %9 = tpu.matmul %7, %8, %cst_12 {dimension_numbers = #tpu.dot_dimension_numbers<[1], [0], [0], [1], [0, 0, 1, 1], [], []>} : vector<1x32xbf16>, vector<32x32xbf16>, vector<1x32xf32> -> vector<1x32xf32>
    %10 = arith.addf %6, %9 : vector<1x32xf32>
    %11 = arith.truncf %3 : vector<1x32xf32> to vector<1x32xbf16>
    %c0_13 = arith.constant 0 : index
    %c0_14 = arith.constant 0 : index
    %12 = vector.load %arg12[%c0_13, %c0_14] : memref<32x32xbf16, #tpu.memory_space<vmem>>, vector<32x32xbf16>
    %cst_15 = arith.constant dense<0.000000e+00> : vector<1x32xf32>
    %13 = tpu.matmul %11, %12, %cst_15 {dimension_numbers = #tpu.dot_dimension_numbers<[1], [0], [0], [1], [0, 0, 1, 1], [], []>} : vector<1x32xbf16>, vector<32x32xbf16>, vector<1x32xf32> -> vector<1x32xf32>
    %14 = arith.addf %10, %13 : vector<1x32xf32>
    %c0_16 = arith.constant 0 : index
    %c0_17 = arith.constant 0 : index
    %15 = vector.load %arg15[%c0_16, %c0_17] : memref<1x32xf32, #tpu.memory_space<vmem>>, vector<1x32xf32>
    %16 = arith.addf %14, %15 : vector<1x32xf32>
    %17 = arith.negf %16 : vector<1x32xf32>
    %18 = math.exp %17 : vector<1x32xf32>
    %cst_18 = arith.constant 1.000000e+00 : f32
    %19 = vector.broadcast %cst_18 : f32 to vector<1x32xf32>
    %20 = arith.addf %19, %18 : vector<1x32xf32>
    %21 = arith.divf %19, %20 : vector<1x32xf32>
    %c0_19 = arith.constant 0 : index
    %c0_20 = arith.constant 0 : index
    %22 = vector.load %arg7[%c0_19, %c0_20] : memref<32x32xbf16, #tpu.memory_space<vmem>>, vector<32x32xbf16>
    %cst_21 = arith.constant dense<0.000000e+00> : vector<1x32xf32>
    %23 = tpu.matmul %1, %22, %cst_21 {dimension_numbers = #tpu.dot_dimension_numbers<[1], [0], [0], [1], [0, 0, 1, 1], [], []>} : vector<1x32xbf16>, vector<32x32xbf16>, vector<1x32xf32> -> vector<1x32xf32>
    %24 = arith.truncf %2 : vector<1x32xf32> to vector<1x32xbf16>
    %c0_22 = arith.constant 0 : index
    %c0_23 = arith.constant 0 : index
    %25 = vector.load %arg10[%c0_22, %c0_23] : memref<32x32xbf16, #tpu.memory_space<vmem>>, vector<32x32xbf16>
    %cst_24 = arith.constant dense<0.000000e+00> : vector<1x32xf32>
    %26 = tpu.matmul %24, %25, %cst_24 {dimension_numbers = #tpu.dot_dimension_numbers<[1], [0], [0], [1], [0, 0, 1, 1], [], []>} : vector<1x32xbf16>, vector<32x32xbf16>, vector<1x32xf32> -> vector<1x32xf32>
    %27 = arith.addf %23, %26 : vector<1x32xf32>
    %28 = arith.truncf %3 : vector<1x32xf32> to vector<1x32xbf16>
    %c0_25 = arith.constant 0 : index
    %c0_26 = arith.constant 0 : index
    %29 = vector.load %arg13[%c0_25, %c0_26] : memref<32x32xbf16, #tpu.memory_space<vmem>>, vector<32x32xbf16>
    %cst_27 = arith.constant dense<0.000000e+00> : vector<1x32xf32>
    %30 = tpu.matmul %28, %29, %cst_27 {dimension_numbers = #tpu.dot_dimension_numbers<[1], [0], [0], [1], [0, 0, 1, 1], [], []>} : vector<1x32xbf16>, vector<32x32xbf16>, vector<1x32xf32> -> vector<1x32xf32>
    %31 = arith.addf %27, %30 : vector<1x32xf32>
    %c0_28 = arith.constant 0 : index
    %c0_29 = arith.constant 0 : index
    %32 = vector.load %arg16[%c0_28, %c0_29] : memref<1x32xf32, #tpu.memory_space<vmem>>, vector<1x32xf32>
    %33 = arith.addf %31, %32 : vector<1x32xf32>
    %34 = arith.negf %33 : vector<1x32xf32>
    %35 = math.exp %34 : vector<1x32xf32>
    %cst_30 = arith.constant 1.000000e+00 : f32
    %36 = vector.broadcast %cst_30 : f32 to vector<1x32xf32>
    %37 = arith.addf %36, %35 : vector<1x32xf32>
    %38 = arith.divf %36, %37 : vector<1x32xf32>
    %c0_31 = arith.constant 0 : index
    %c0_32 = arith.constant 0 : index
    %39 = vector.load %arg8[%c0_31, %c0_32] : memref<32x32xbf16, #tpu.memory_space<vmem>>, vector<32x32xbf16>
    %cst_33 = arith.constant dense<0.000000e+00> : vector<1x32xf32>
    %40 = tpu.matmul %1, %39, %cst_33 {dimension_numbers = #tpu.dot_dimension_numbers<[1], [0], [0], [1], [0, 0, 1, 1], [], []>} : vector<1x32xbf16>, vector<32x32xbf16>, vector<1x32xf32> -> vector<1x32xf32>
    %41 = arith.truncf %2 : vector<1x32xf32> to vector<1x32xbf16>
    %c0_34 = arith.constant 0 : index
    %c0_35 = arith.constant 0 : index
    %42 = vector.load %arg11[%c0_34, %c0_35] : memref<32x32xbf16, #tpu.memory_space<vmem>>, vector<32x32xbf16>
    %cst_36 = arith.constant dense<0.000000e+00> : vector<1x32xf32>
    %43 = tpu.matmul %41, %42, %cst_36 {dimension_numbers = #tpu.dot_dimension_numbers<[1], [0], [0], [1], [0, 0, 1, 1], [], []>} : vector<1x32xbf16>, vector<32x32xbf16>, vector<1x32xf32> -> vector<1x32xf32>
    %44 = arith.addf %40, %43 : vector<1x32xf32>
    %c0_37 = arith.constant 0 : index
    %c0_38 = arith.constant 0 : index
    %45 = vector.load %arg17[%c0_37, %c0_38] : memref<1x32xf32, #tpu.memory_space<vmem>>, vector<1x32xf32>
    %46 = arith.addf %44, %45 : vector<1x32xf32>
    %47 = arith.truncf %3 : vector<1x32xf32> to vector<1x32xbf16>
    %c0_39 = arith.constant 0 : index
    %c0_40 = arith.constant 0 : index
    %48 = vector.load %arg14[%c0_39, %c0_40] : memref<32x32xbf16, #tpu.memory_space<vmem>>, vector<32x32xbf16>
    %cst_41 = arith.constant dense<0.000000e+00> : vector<1x32xf32>
    %49 = tpu.matmul %47, %48, %cst_41 {dimension_numbers = #tpu.dot_dimension_numbers<[1], [0], [0], [1], [0, 0, 1, 1], [], []>} : vector<1x32xbf16>, vector<32x32xbf16>, vector<1x32xf32> -> vector<1x32xf32>
    %c0_42 = arith.constant 0 : index
    %c0_43 = arith.constant 0 : index
    %50 = vector.load %arg18[%c0_42, %c0_43] : memref<1x32xf32, #tpu.memory_space<vmem>>, vector<1x32xf32>
    %51 = arith.addf %49, %50 : vector<1x32xf32>
    %52 = arith.mulf %21, %51 : vector<1x32xf32>
    %53 = arith.addf %46, %52 : vector<1x32xf32>
    %54 = math.tanh %53 : vector<1x32xf32>
    %cst_44 = arith.constant 1.000000e+00 : f32
    %55 = vector.broadcast %cst_44 : f32 to vector<1x32xf32>
    %56 = arith.subf %55, %38 : vector<1x32xf32>
    %57 = arith.mulf %56, %54 : vector<1x32xf32>
    %58 = arith.mulf %38, %3 : vector<1x32xf32>
    %59 = arith.addf %57, %58 : vector<1x32xf32>
    %60 = arith.truncf %59 : vector<1x32xf32> to vector<1x32xbf16>
    %c0_45 = arith.constant 0 : index
    %c0_46 = arith.constant 0 : index
    %61 = vector.load %arg19[%c0_45, %c0_46] : memref<32x32xbf16, #tpu.memory_space<vmem>>, vector<32x32xbf16>
    %cst_47 = arith.constant dense<0.000000e+00> : vector<1x32xf32>
    %62 = tpu.matmul %60, %61, %cst_47 {dimension_numbers = #tpu.dot_dimension_numbers<[1], [0], [0], [1], [0, 0, 1, 1], [], []>} : vector<1x32xbf16>, vector<32x32xbf16>, vector<1x32xf32> -> vector<1x32xf32>
    %c0_48 = arith.constant 0 : index
    %c0_49 = arith.constant 0 : index
    %63 = vector.load %arg20[%c0_48, %c0_49] : memref<1x32xf32, #tpu.memory_space<vmem>>, vector<1x32xf32>
    %64 = arith.mulf %59, %63 : vector<1x32xf32>
    %cst_50 = arith.constant dense<0.000000e+00> : vector<1xf32>
    %65 = vector.multi_reduction <add>, %64, %cst_50 [1] : vector<1x32xf32> to vector<1xf32>
    %66 = vector.shape_cast %65 : vector<1xf32> to vector<1x1xf32>
    %67 = arith.truncf %62 : vector<1x32xf32> to vector<1x32xbf16>
    %cst_51 = arith.constant dense<0.000000e+00> : vector<1x8xf32>
    %68 = tpu.matmul %67, %4, %cst_51 {dimension_numbers = #tpu.dot_dimension_numbers<[1], [1], [0], [0], [0, 0, 1, 0], [], []>} : vector<1x32xbf16>, vector<8x32xbf16>, vector<1x8xf32> -> vector<1x8xf32>
    %69 = vector.broadcast %66 : vector<1x1xf32> to vector<1x8xf32>
    %70 = arith.addf %68, %69 : vector<1x8xf32>
    %cst_52 = arith.constant dense<0xFF800000> : vector<1xf32>
    %71 = vector.multi_reduction <maximumf>, %70, %cst_52 [1] : vector<1x8xf32> to vector<1xf32>
    %72 = vector.shape_cast %71 : vector<1xf32> to vector<1x1xf32>
    %73 = vector.broadcast %72 : vector<1x1xf32> to vector<1x8xf32>
    %74 = arith.subf %70, %73 : vector<1x8xf32>
    %75 = math.exp %74 : vector<1x8xf32>
    %cst_53 = arith.constant dense<0.000000e+00> : vector<1xf32>
    %76 = vector.multi_reduction <add>, %75, %cst_53 [1] : vector<1x8xf32> to vector<1xf32>
    %77 = vector.shape_cast %76 : vector<1xf32> to vector<1x1xf32>
    %78 = vector.broadcast %77 : vector<1x1xf32> to vector<1x8xf32>
    %79 = arith.divf %75, %78 : vector<1x8xf32>
    %80 = arith.truncf %79 : vector<1x8xf32> to vector<1x8xbf16>
    %cst_54 = arith.constant dense<0.000000e+00> : vector<1x32xf32>
    %81 = tpu.matmul %80, %4, %cst_54 {dimension_numbers = #tpu.dot_dimension_numbers<[1], [0], [0], [1], [0, 0, 1, 1], [], []>} : vector<1x8xbf16>, vector<8x32xbf16>, vector<1x32xf32> -> vector<1x32xf32>
    %82 = arith.truncf %59 : vector<1x32xf32> to vector<1x32xbf16>
    %c0_55 = arith.constant 0 : index
    %c0_56 = arith.constant 0 : index
    %83 = vector.load %arg21[%c0_55, %c0_56] : memref<32x64xbf16, #tpu.memory_space<vmem>>, vector<32x64xbf16>
    %cst_57 = arith.constant dense<0.000000e+00> : vector<1x64xf32>
    %84 = tpu.matmul %82, %83, %cst_57 {dimension_numbers = #tpu.dot_dimension_numbers<[1], [0], [0], [1], [0, 0, 1, 1], [], []>} : vector<1x32xbf16>, vector<32x64xbf16>, vector<1x64xf32> -> vector<1x64xf32>
    %85 = arith.truncf %81 : vector<1x32xf32> to vector<1x32xbf16>
    %c0_58 = arith.constant 0 : index
    %c0_59 = arith.constant 0 : index
    %86 = vector.load %arg22[%c0_58, %c0_59] : memref<32x64xbf16, #tpu.memory_space<vmem>>, vector<32x64xbf16>
    %cst_60 = arith.constant dense<0.000000e+00> : vector<1x64xf32>
    %87 = tpu.matmul %85, %86, %cst_60 {dimension_numbers = #tpu.dot_dimension_numbers<[1], [0], [0], [1], [0, 0, 1, 1], [], []>} : vector<1x32xbf16>, vector<32x64xbf16>, vector<1x64xf32> -> vector<1x64xf32>
    %88 = arith.addf %84, %87 : vector<1x64xf32>
    %c0_61 = arith.constant 0 : index
    %c0_62 = arith.constant 0 : index
    %89 = vector.load %arg23[%c0_61, %c0_62] : memref<1x64xf32, #tpu.memory_space<vmem>>, vector<1x64xf32>
    %90 = arith.addf %88, %89 : vector<1x64xf32>
    %cst_63 = arith.constant dense<0xFF800000> : vector<1xf32>
    %91 = vector.multi_reduction <maximumf>, %90, %cst_63 [1] : vector<1x64xf32> to vector<1xf32>
    %92 = vector.shape_cast %91 : vector<1xf32> to vector<1x1xf32>
    %93 = vector.broadcast %92 : vector<1x1xf32> to vector<1x64xf32>
    %94 = arith.subf %90, %93 : vector<1x64xf32>
    %95 = math.exp %94 : vector<1x64xf32>
    %cst_64 = arith.constant dense<0.000000e+00> : vector<1xf32>
    %96 = vector.multi_reduction <add>, %95, %cst_64 [1] : vector<1x64xf32> to vector<1xf32>
    %97 = vector.shape_cast %96 : vector<1xf32> to vector<1x1xf32>
    %98 = math.log %97 : vector<1x1xf32>
    %99 = arith.addf %98, %92 : vector<1x1xf32>
    %100 = vector.broadcast %99 : vector<1x1xf32> to vector<1x64xf32>
    %101 = arith.subf %90, %100 : vector<1x64xf32>
    %c0_65 = arith.constant 0 : index
    %c0_66 = arith.constant 0 : index
    %102 = vector.load %arg24[%c0_65, %c0_66] : memref<1x512xf32, #tpu.memory_space<vmem>>, vector<1x64xf32>
    tpu.vector_store %arg24[%c0_65, %c0_66], %101 {strides = array<i32>} : memref<1x512xf32, #tpu.memory_space<vmem>>, vector<1x64xf32>,
    %c0_67 = arith.constant 0 : index
    %c128 = arith.constant 128 : index
    %103 = vector.load %arg24[%c0_67, %c128] : memref<1x512xf32, #tpu.memory_space<vmem>>, vector<1x32xf32>
    tpu.vector_store %arg24[%c0_67, %c128], %81 {strides = array<i32>} : memref<1x512xf32, #tpu.memory_space<vmem>>, vector<1x32xf32>,
    %c0_68 = arith.constant 0 : index
    %c256 = arith.constant 256 : index
    %104 = vector.load %arg24[%c0_68, %c256] : memref<1x512xf32, #tpu.memory_space<vmem>>, vector<1x32xf32>
    tpu.vector_store %arg24[%c0_68, %c256], %59 {strides = array<i32>} : memref<1x512xf32, #tpu.memory_space<vmem>>, vector<1x32xf32>,
    %c0_69 = arith.constant 0 : index
    %c384 = arith.constant 384 : index
    %105 = vector.load %arg24[%c0_69, %c384] : memref<1x512xf32, #tpu.memory_space<vmem>>, vector<1x8xf32>
    tpu.vector_store %arg24[%c0_69, %c384], %79 {strides = array<i32>} : memref<1x512xf32, #tpu.memory_space<vmem>>, vector<1x8xf32>,
    return
  }
  func.func @transform_0(%arg0: i32, %arg1: memref<1xi32, #tpu.memory_space<smem>>) -> (i32, i32, i32) {
    %c0 = arith.constant 0 : index
    %0 = memref.load %arg1[%c0] : memref<1xi32, #tpu.memory_space<smem>>
    %c0_i32 = arith.constant 0 : i32
    %c0_i32_0 = arith.constant 0 : i32
    %c0_i32_1 = arith.constant 0 : i32
    return %0, %c0_i32, %c0_i32_0 : i32, i32, i32
  }
  func.func @transform_1(%arg0: i32, %arg1: memref<1xi32, #tpu.memory_space<smem>>) -> (i32, i32) {
    %c0_i32 = arith.constant 0 : i32
    %c0_i32_0 = arith.constant 0 : i32
    %c0_i32_1 = arith.constant 0 : i32
    return %c0_i32, %c0_i32_0 : i32, i32
  }
  func.func @transform_2(%arg0: i32, %arg1: memref<1xi32, #tpu.memory_space<smem>>) -> (i32, i32) {
    %c0_i32 = arith.constant 0 : i32
    %c0_i32_0 = arith.constant 0 : i32
    %c0_i32_1 = arith.constant 0 : i32
    return %c0_i32, %c0_i32_0 : i32, i32
  }
  func.func @transform_3(%arg0: i32, %arg1: memref<1xi32, #tpu.memory_space<smem>>) -> (i32, i32) {
    %c0_i32 = arith.constant 0 : i32
    %c0_i32_0 = arith.constant 0 : i32
    %c0_i32_1 = arith.constant 0 : i32
    return %c0_i32, %c0_i32_0 : i32, i32
  }
  func.func @transform_4(%arg0: i32, %arg1: memref<1xi32, #tpu.memory_space<smem>>) -> (i32, i32) {
    %c0_i32 = arith.constant 0 : i32
    %c0_i32_0 = arith.constant 0 : i32
    %c0_i32_1 = arith.constant 0 : i32
    return %c0_i32, %c0_i32_0 : i32, i32
  }
  func.func @transform_5(%arg0: i32, %arg1: memref<1xi32, #tpu.memory_space<smem>>) -> (i32, i32) {
    %c0_i32 = arith.constant 0 : i32
    %c0_i32_0 = arith.constant 0 : i32
    %c0_i32_1 = arith.constant 0 : i32
    return %c0_i32, %c0_i32_0 : i32, i32
  }
  func.func @transform_6(%arg0: i32, %arg1: memref<1xi32, #tpu.memory_space<smem>>) -> (i32, i32) {
    %c0_i32 = arith.constant 0 : i32
    %c0_i32_0 = arith.constant 0 : i32
    %c0_i32_1 = arith.constant 0 : i32
    return %c0_i32, %c0_i32_0 : i32, i32
  }
  func.func @transform_7(%arg0: i32, %arg1: memref<1xi32, #tpu.memory_space<smem>>) -> (i32, i32) {
    %c0_i32 = arith.constant 0 : i32
    %c0_i32_0 = arith.constant 0 : i32
    %c0_i32_1 = arith.constant 0 : i32
    return %c0_i32, %c0_i32_0 : i32, i32
  }
  func.func @transform_8(%arg0: i32, %arg1: memref<1xi32, #tpu.memory_space<smem>>) -> (i32, i32) {
    %c0_i32 = arith.constant 0 : i32
    %c0_i32_0 = arith.constant 0 : i32
    %c0_i32_1 = arith.constant 0 : i32
    return %c0_i32, %c0_i32_0 : i32, i32
  }
  func.func @transform_9(%arg0: i32, %arg1: memref<1xi32, #tpu.memory_space<smem>>) -> (i32, i32) {
    %c0_i32 = arith.constant 0 : i32
    %c0_i32_0 = arith.constant 0 : i32
    %c0_i32_1 = arith.constant 0 : i32
    return %c0_i32, %c0_i32_0 : i32, i32
  }
  func.func @transform_10(%arg0: i32, %arg1: memref<1xi32, #tpu.memory_space<smem>>) -> (i32, i32) {
    %c0_i32 = arith.constant 0 : i32
    %c0_i32_0 = arith.constant 0 : i32
    %c0_i32_1 = arith.constant 0 : i32
    return %c0_i32, %c0_i32_0 : i32, i32
  }
  func.func @transform_11(%arg0: i32, %arg1: memref<1xi32, #tpu.memory_space<smem>>) -> (i32, i32) {
    %c0_i32 = arith.constant 0 : i32
    %c0_i32_0 = arith.constant 0 : i32
    %c0_i32_1 = arith.constant 0 : i32
    return %c0_i32, %c0_i32_0 : i32, i32
  }
  func.func @transform_12(%arg0: i32, %arg1: memref<1xi32, #tpu.memory_space<smem>>) -> (i32, i32) {
    %c0_i32 = arith.constant 0 : i32
    %c0_i32_0 = arith.constant 0 : i32
    %c0_i32_1 = arith.constant 0 : i32
    return %c0_i32, %c0_i32_0 : i32, i32
  }
  func.func @transform_13(%arg0: i32, %arg1: memref<1xi32, #tpu.memory_space<smem>>) -> (i32, i32) {
    %c0_i32 = arith.constant 0 : i32
    %c0_i32_0 = arith.constant 0 : i32
    %c0_i32_1 = arith.constant 0 : i32
    return %c0_i32, %c0_i32_0 : i32, i32
  }
  func.func @transform_14(%arg0: i32, %arg1: memref<1xi32, #tpu.memory_space<smem>>) -> (i32, i32) {
    %c0_i32 = arith.constant 0 : i32
    %c0_i32_0 = arith.constant 0 : i32
    %c0_i32_1 = arith.constant 0 : i32
    return %c0_i32, %c0_i32_0 : i32, i32
  }
  func.func @transform_15(%arg0: i32, %arg1: memref<1xi32, #tpu.memory_space<smem>>) -> (i32, i32) {
    %c0_i32 = arith.constant 0 : i32
    %c0_i32_0 = arith.constant 0 : i32
    %c0_i32_1 = arith.constant 0 : i32
    return %c0_i32, %c0_i32_0 : i32, i32
  }
  func.func @transform_16(%arg0: i32, %arg1: memref<1xi32, #tpu.memory_space<smem>>) -> (i32, i32) {
    %c0_i32 = arith.constant 0 : i32
    %c0_i32_0 = arith.constant 0 : i32
    %c0_i32_1 = arith.constant 0 : i32
    return %c0_i32, %c0_i32_0 : i32, i32
  }
  func.func @transform_17(%arg0: i32, %arg1: memref<1xi32, #tpu.memory_space<smem>>) -> (i32, i32) {
    %c0_i32 = arith.constant 0 : i32
    %c0_i32_0 = arith.constant 0 : i32
    %c0_i32_1 = arith.constant 0 : i32
    return %c0_i32, %c0_i32_0 : i32, i32
  }
  func.func @transform_18(%arg0: i32, %arg1: memref<1xi32, #tpu.memory_space<smem>>) -> (i32, i32) {
    %c0_i32 = arith.constant 0 : i32
    %c0_i32_0 = arith.constant 0 : i32
    %c0_i32_1 = arith.constant 0 : i32
    return %c0_i32, %c0_i32_0 : i32, i32
  }
  func.func @transform_19(%arg0: i32, %arg1: memref<1xi32, #tpu.memory_space<smem>>) -> (i32, i32) {
    %c0_i32 = arith.constant 0 : i32
    %c0_i32_0 = arith.constant 0 : i32
    %c0_i32_1 = arith.constant 0 : i32
    return %c0_i32, %c0_i32_0 : i32, i32
  }
  func.func @transform_20(%arg0: i32, %arg1: memref<1xi32, #tpu.memory_space<smem>>) -> (i32, i32) {
    %c0_i32 = arith.constant 0 : i32
    %c0_i32_0 = arith.constant 0 : i32
    %c0_i32_1 = arith.constant 0 : i32
    return %c0_i32, %c0_i32_0 : i32, i32
  }
  func.func @transform_21(%arg0: i32, %arg1: memref<1xi32, #tpu.memory_space<smem>>) -> (i32, i32) {
    %c0_i32 = arith.constant 0 : i32
    %c0_i32_0 = arith.constant 0 : i32
    %c0_i32_1 = arith.constant 0 : i32
    return %c0_i32, %c0_i32_0 : i32, i32
  }
  func.func @transform_22(%arg0: i32, %arg1: memref<1xi32, #tpu.memory_space<smem>>) -> (i32, i32) {
    %c0_i32 = arith.constant 0 : i32
    %c0_i32_0 = arith.constant 0 : i32
    %c0_i32_1 = arith.constant 0 : i32
    return %c0_i32, %c0_i32_0 : i32, i32
  }
}

</mosaic_0001>

<bundles_post_ra>
// kernel: tpu_custom_call.1
= control target key start
LH: loop header
LB: loop body
LE: loop exit
PB: predicated region body
PF: predicated region fallthrough
CT: control target
= control target key end

     0   :  { %s2043_s0 = inlined_call_operand.<no memory space> [shape: s32[1], index: 0, kind: input, shape index: {}]   ;;  %s2044_s1 = inlined_call_operand.vmem [shape: bf16[64,1,32], index: 1, kind: input, shape index: {}]   ;;  %s2045_s2 = inlined_call_operand.hbm [shape: f32[1,32], index: 2, kind: input, shape index: {}]   ;;  %s2046_s3 = inlined_call_operand.hbm [shape: f32[1,32], index: 3, kind: input, shape index: {}]   ;;  %s2047_s4 = inlined_call_operand.hbm [shape: bf16[8,32], index: 4, kind: input, shape index: {}]   ;;  %s2048_s5 = inlined_call_operand.vmem [shape: bf16[32,32], index: 5, kind: input, shape index: {}]   ;;  %s2049_s6 = inlined_call_operand.vmem [shape: bf16[32,32], index: 6, kind: input, shape index: {}]   ;;  %s2050_s7 = inlined_call_operand.vmem [shape: bf16[32,32], index: 7, kind: input, shape index: {}]   ;;  %s2051_s8 = inlined_call_operand.vmem [shape: bf16[32,32], index: 8, kind: input, shape index: {}]   ;;  %s2052_s9 = inlined_call_operand.vmem [shape: bf16[32,32], index: 9, kind: input, shape index: {}]   ;;  %s2053_s10 = inlined_call_operand.vmem [shape: bf16[32,32], index: 10, kind: input, shape index: {}]   ;;  %s2054_s11 = inlined_call_operand.vmem [shape: bf16[32,32], index: 11, kind: input, shape index: {}]   ;;  %s2055_s12 = inlined_call_operand.hbm [shape: bf16[32,32], index: 12, kind: input, shape index: {}]   ;;  %s2056_s13 = inlined_call_operand.vmem [shape: bf16[32,32], index: 13, kind: input, shape index: {}]   ;;  %s2057_s14 = inlined_call_operand.hbm [shape: f32[1,32], index: 14, kind: input, shape index: {}]   ;;  %s2058_s15 = inlined_call_operand.hbm [shape: f32[1,32], index: 15, kind: input, shape index: {}]   ;;  %s2059_s16 = inlined_call_operand.hbm [shape: f32[1,32], index: 16, kind: input, shape index: {}]   ;;  %s2060_s17 = inlined_call_operand.hbm [shape: f32[1,32], index: 17, kind: input, shape index: {}]   ;;  %s2061_s18 = inlined_call_operand.vmem [shape: bf16[32,32], index: 18, kind: input, shape index: {}]   ;;  %s2062_s19 = inlined_call_operand.vmem [shape: f32[1,32], index: 19, kind: input, shape index: {}]   ;;  %s2063_s20 = inlined_call_operand.hbm [shape: bf16[32,64], index: 20, kind: input, shape index: {}]   ;;  %s2064_s21 = inlined_call_operand.hbm [shape: bf16[32,64], index: 21, kind: input, shape index: {}]   ;;  %s2065_s22 = inlined_call_operand.vmem [shape: f32[1,64], index: 22, kind: input, shape index: {}]   ;;  %s2066_s23 = inlined_call_operand.hbm [shape: f32[1,512], index: 23, kind: output, shape index: {}]  }
   0x1   :  { %2075 = sst [smem:[#allocation29_spill]] %s2043_s0 }
   0x2   :  { %2076 = sst [smem:[#allocation30_spill]] %s2044_s1 }
   0x3   :  { %2077 = sst [smem:[#allocation31_spill]] %s2045_s2 }
   0x4   :  { %2078 = sst [smem:[#allocation32_spill]] %s2046_s3 }
   0x5   :  { %2079 = sst [smem:[#allocation33_spill]] %s2047_s4 }
   0x6   :  { %2080 = sst [smem:[#allocation34_spill]] %s2048_s5 }
   0x7   :  { %2081 = sst [smem:[#allocation35_spill]] %s2049_s6 }
   0x8   :  { %2082 = sst [smem:[#allocation36_spill]] %s2050_s7 }
   0x9   :  { %2083 = sst [smem:[#allocation37_spill]] %s2066_s23 }
   0xa   :  { %29 = vsyncpa [#allocation5], 0 }
   0xb   :  { %30 = vsyncpa [#allocation8], 0 }
   0xc   :  { %31 = vsyncpa [#allocation11], 0 }
   0xd   :  { %32 = vsyncpa [#allocation14], 0 }
   0xe   :  { %33 = vsyncpa [#allocation17], 0 }
   0xf   :  { %34 = vsyncpa [#allocation20], 0 }
  0x10   :  { %35 = vsyncpa [#allocation6], 0  ;;  %s1600_s4 = smov [#allocation7]   ;;  %s1601_s24 = smov [#allocation10]  }
  0x11   :  { %s59_s30 = sshll.u32 %s1600_s4, 4  ;;  %s92_s25 = sshll.u32 %s1601_s24, 4  ;;  %s60_s30 = int_to_ptr.vmem [resolvable:$true] %s59_s30  ;;  %s1735_s25 = int_to_ptr.vmem [resolvable:$true] %s92_s25 }
  0x12   :  { %s2084_s26 = sld [smem:[#allocation32_spill]] }
  0x18   :  { %s1344_s2 = scalar_lea.hbm %s2084_s26, 16 }
  0x19   :  { %p1345_p0 = scmp.ne.s32.totalorder %s2084_s26, %s1344_s2  ;;  %p1348_p1 = scmp.lt.u32.totalorder %s1344_s2, %s2084_s26 }
  0x1b   :  { %p1350_p2 = pnand %p1348_p1, %p1345_p0 }
  0x1d   :  { %1353 = shalt.err (!%p1350_p2)
}
  0x1e   :  { %s1354_s29 = scalar_lea.vmem %s60_s30, 16  ;;  %s1358_s3 = scalar_lea.vmem %s60_s30, 32 }
  0x1f   :  { %p1355_p3 = scmp.ne.s32.totalorder %s60_s30, %s1354_s29  ;;  %p1359_p4 = scmp.lt.s32.totalorder %s60_s30, %s60_s30 }
  0x20   :  { %p1360_p5 = scmp.lt.s32.totalorder %s1358_s3, %s1354_s29 }
  0x22   :  { %p1361_p6 = por %p1360_p5, %p1359_p4 }
  0x24   :  { %p1362_p7 = pnand %p1361_p6, %p1355_p3 }
  0x26   :  { %1365 = shalt.err (!%p1362_p7)
}
  0x27   :  { %62 = dma.hbm_to_vmem [thread:$0]  %s2084_s26, 16, %s60_s30, [#allocation8]  }
  0x28   :  { %s1366_s1 = scalar_lea.hbm %s2055_s12, 256 }
  0x29   :  { %p1367_p8 = scmp.ne.s32.totalorder %s2055_s12, %s1366_s1  ;;  %p1370_p9 = scmp.lt.u32.totalorder %s1366_s1, %s2055_s12 }
  0x2b   :  { %p1372_p10 = pnand %p1370_p9, %p1367_p8 }
  0x2d   :  { %1375 = shalt.err (!%p1372_p10)
}
  0x2e   :  { %s1376_s28 = scalar_lea.vmem %s1735_s25, 256  ;;  %p1381_p12 = scmp.lt.s32.totalorder %s1735_s25, %s1735_s25 }
  0x2f   :  { %p1377_p11 = scmp.ne.s32.totalorder %s1735_s25, %s1376_s28  ;;  %p1382_p13 = scmp.lt.s32.totalorder %s1376_s28, %s1376_s28 }
  0x31   :  { %p1383_p0 = por %p1382_p13, %p1381_p12 }
  0x33   :  { %p1384_p1 = pnand %p1383_p0, %p1377_p11 }
  0x35   :  { %1387 = shalt.err (!%p1384_p1)
}
  0x36   :  { %s1602_s30 = smov 64   ;;  %s1603_s26 = smov 4  }
  0x37   :  { %98 = dma.hbm_to_vmem [thread:$0]  %s2055_s12, 256, %s1735_s25, [#allocation11], %s1602_s30, %s1602_s30, %s1603_s26  }
  0x38   :  { %s1604_s0 = smov [#allocation13]   ;;  %s1605_s24 = smov [#allocation16]  }
  0x39   :  { %s117_s4 = sshll.u32 %s1604_s0, 4  ;;  %s137_s5 = sshll.u32 %s1605_s24, 4  ;;  %s118_s4 = int_to_ptr.vmem [resolvable:$true] %s117_s4  ;;  %s138_s5 = int_to_ptr.vmem [resolvable:$true] %s137_s5 }
  0x3a   :  { %s1388_s2 = scalar_lea.hbm %s2058_s15, 16 }
  0x3b   :  { %p1389_p2 = scmp.ne.s32.totalorder %s2058_s15, %s1388_s2  ;;  %p1392_p3 = scmp.lt.u32.totalorder %s1388_s2, %s2058_s15 }
  0x3d   :  { %p1394_p4 = pnand %p1392_p3, %p1389_p2 }
  0x3f   :  { %1397 = shalt.err (!%p1394_p4)
}
  0x40   :  { %s1398_s12 = scalar_lea.vmem %s118_s4, 16  ;;  %s1402_s25 = scalar_lea.vmem %s118_s4, 32 }
  0x41   :  { %p1399_p5 = scmp.ne.s32.totalorder %s118_s4, %s1398_s12  ;;  %p1403_p6 = scmp.lt.s32.totalorder %s118_s4, %s118_s4 }
  0x42   :  { %p1404_p7 = scmp.lt.s32.totalorder %s1402_s25, %s1398_s12 }
  0x44   :  { %p1405_p8 = por %p1404_p7, %p1403_p6 }
  0x46   :  { %p1406_p9 = pnand %p1405_p8, %p1399_p5 }
  0x48   :  { %1409 = shalt.err (!%p1406_p9)
}
  0x49   :  { %120 = dma.hbm_to_vmem [thread:$0]  %s2058_s15, 16, %s118_s4, [#allocation14]  }
  0x4a   :  { %s1410_s1 = scalar_lea.hbm %s2060_s17, 16 }
  0x4b   :  { %p1411_p10 = scmp.ne.s32.totalorder %s2060_s17, %s1410_s1  ;;  %p1414_p11 = scmp.lt.u32.totalorder %s1410_s1, %s2060_s17 }
  0x4d   :  { %p1416_p12 = pnand %p1414_p11, %p1411_p10 }
  0x4f   :  { %1419 = shalt.err (!%p1416_p12)
}
  0x50   :  { %s1420_s7 = scalar_lea.vmem %s138_s5, 16  ;;  %s1424_s28 = scalar_lea.vmem %s138_s5, 32 }
  0x51   :  { %p1421_p13 = scmp.ne.s32.totalorder %s138_s5, %s1420_s7  ;;  %p1425_p0 = scmp.lt.s32.totalorder %s138_s5, %s138_s5 }
  0x52   :  { %p1426_p1 = scmp.lt.s32.totalorder %s1424_s28, %s1420_s7 }
  0x54   :  { %p1427_p2 = por %p1426_p1, %p1425_p0 }
  0x56   :  { %p1428_p3 = pnand %p1427_p2, %p1421_p13 }
  0x58   :  { %1431 = shalt.err (!%p1428_p3)
}
  0x59   :  { %140 = dma.hbm_to_vmem [thread:$0]  %s2060_s17, 16, %s138_s5, [#allocation17]  }
  0x5a   :  { %s1606_s12 = smov [#allocation4]   ;;  %s1607_s29 = smov [#allocation9]  }
  0x5b   :  { %s49_s25 = sshll.u32 %s1606_s12, 4  ;;  %s69_s3 = sshll.u32 %s1607_s29, 4  ;;  %s50_s25 = int_to_ptr.vmem [resolvable:$true] %s49_s25  ;;  %s70_s3 = int_to_ptr.vmem [resolvable:$true] %s69_s3 }
  0x5c   :  { %s2085_s1 = sld [smem:[#allocation31_spill]] }
  0x62   :  { %s1432_s23 = scalar_lea.hbm %s2085_s1, 16 }
  0x63   :  { %p1433_p4 = scmp.ne.s32.totalorder %s2085_s1, %s1432_s23  ;;  %p1436_p5 = scmp.lt.u32.totalorder %s1432_s23, %s2085_s1 }
  0x65   :  { %p1438_p6 = pnand %p1436_p5, %p1433_p4 }
  0x67   :  { %1441 = shalt.err (!%p1438_p6)
}
  0x68   :  { %s1442_s17 = scalar_lea.vmem %s50_s25, 16  ;;  %s1446_s5 = scalar_lea.vmem %s50_s25, 32 }
  0x69   :  { %p1443_p7 = scmp.ne.s32.totalorder %s50_s25, %s1442_s17  ;;  %p1447_p8 = scmp.lt.s32.totalorder %s50_s25, %s50_s25 }
  0x6a   :  { %p1448_p9 = scmp.lt.s32.totalorder %s1446_s5, %s1442_s17 }
  0x6c   :  { %p1449_p10 = por %p1448_p9, %p1447_p8 }
  0x6e   :  { %p1450_p11 = pnand %p1449_p10, %p1443_p7 }
  0x70   :  { %1453 = shalt.err (!%p1450_p11)
}
  0x71   :  { %52 = dma.hbm_to_vmem [thread:$0]  %s2085_s1, 16, %s50_s25, [#allocation5]  }
  0x72   :  { %s2086_s29 = sld [smem:[#allocation33_spill]] }
  0x78   :  { %s1454_s0 = scalar_lea.hbm %s2086_s29, 64 }
  0x79   :  { %p1455_p12 = scmp.ne.s32.totalorder %s2086_s29, %s1454_s0  ;;  %p1458_p13 = scmp.lt.u32.totalorder %s1454_s0, %s2086_s29 }
  0x7b   :  { %p1460_p0 = pnand %p1458_p13, %p1455_p12 }
  0x7d   :  { %1463 = shalt.err (!%p1460_p0)
}
  0x7e   :  { %s1464_s27 = scalar_lea.vmem %s70_s3, 64  ;;  %p1469_p2 = scmp.lt.s32.totalorder %s70_s3, %s70_s3 }
  0x7f   :  { %p1465_p1 = scmp.ne.s32.totalorder %s70_s3, %s1464_s27  ;;  %p1470_p3 = scmp.lt.s32.totalorder %s1464_s27, %s1464_s27 }
  0x81   :  { %p1471_p4 = por %p1470_p3, %p1469_p2 }
  0x83   :  { %p1472_p5 = pnand %p1471_p4, %p1465_p1 }
  0x85   :  { %1475 = shalt.err (!%p1472_p5)
}
  0x86   :  { %72 = dma.hbm_to_vmem [thread:$0]  %s2086_s29, 64, %s70_s3, [#allocation8]  }
  0x87   :  { %s1608_s7 = smov [#allocation12]   ;;  %s1609_s5 = smov [#allocation15]  }
  0x88   :  { %s107_s17 = sshll.u32 %s1608_s7, 4  ;;  %s127_s28 = sshll.u32 %s1609_s5, 4  ;;  %s108_s17 = int_to_ptr.vmem [resolvable:$true] %s107_s17  ;;  %s128_s28 = int_to_ptr.vmem [resolvable:$true] %s127_s28 }
  0x89   :  { %s1476_s12 = scalar_lea.hbm %s2057_s14, 16 }
  0x8a   :  { %p1477_p6 = scmp.ne.s32.totalorder %s2057_s14, %s1476_s12  ;;  %p1480_p7 = scmp.lt.u32.totalorder %s1476_s12, %s2057_s14 }
  0x8c   :  { %p1482_p8 = pnand %p1480_p7, %p1477_p6 }
  0x8e   :  { %1485 = shalt.err (!%p1482_p8)
}
  0x8f   :  { %s1486_s3 = scalar_lea.vmem %s108_s17, 16  ;;  %s1490_s29 = scalar_lea.vmem %s108_s17, 32 }
  0x90   :  { %p1487_p9 = scmp.ne.s32.totalorder %s108_s17, %s1486_s3  ;;  %p1491_p10 = scmp.lt.s32.totalorder %s108_s17, %s108_s17 }
  0x91   :  { %p1492_p11 = scmp.lt.s32.totalorder %s1490_s29, %s1486_s3 }
  0x93   :  { %p1493_p12 = por %p1492_p11, %p1491_p10 }
  0x95   :  { %p1494_p13 = pnand %p1493_p12, %p1487_p9 }
  0x97   :  { %1497 = shalt.err (!%p1494_p13)
}
  0x98   :  { %110 = dma.hbm_to_vmem [thread:$0]  %s2057_s14, 16, %s108_s17, [#allocation11]  }
  0x99   :  { %s1498_s7 = scalar_lea.hbm %s2059_s16, 16 }
  0x9a   :  { %p1499_p0 = scmp.ne.s32.totalorder %s2059_s16, %s1498_s7  ;;  %p1502_p1 = scmp.lt.u32.totalorder %s1498_s7, %s2059_s16 }
  0x9c   :  { %p1504_p2 = pnand %p1502_p1, %p1499_p0 }
  0x9e   :  { %1507 = shalt.err (!%p1504_p2)
}
  0x9f   :  { %s1508_s0 = scalar_lea.vmem %s128_s28, 16  ;;  %s1512_s24 = scalar_lea.vmem %s128_s28, 32 }
  0xa0   :  { %p1509_p3 = scmp.ne.s32.totalorder %s128_s28, %s1508_s0  ;;  %p1513_p4 = scmp.lt.s32.totalorder %s128_s28, %s128_s28 }
  0xa1   :  { %p1514_p5 = scmp.lt.s32.totalorder %s1512_s24, %s1508_s0 }
  0xa3   :  { %p1515_p6 = por %p1514_p5, %p1513_p4 }
  0xa5   :  { %p1516_p7 = pnand %p1515_p6, %p1509_p3 }
  0xa7   :  { %1519 = shalt.err (!%p1516_p7)
}
  0xa8   :  { %130 = dma.hbm_to_vmem [thread:$0]  %s2059_s16, 16, %s128_s28, [#allocation14]  }
  0xa9   :  { %s1610_s23 = smov [#allocation18]   ;;  %s1611_s3 = smov [#allocation19]  }
  0xaa   :  { %s150_s6 = sshll.u32 %s1610_s23, 4  ;;  %s162_s29 = sshll.u32 %s1611_s3, 4  ;;  %s151_s6 = int_to_ptr.vmem [resolvable:$true] %s150_s6  ;;  %s1841_s29 = int_to_ptr.vmem [resolvable:$true] %s162_s29 }
  0xab   :  { %s1520_s25 = scalar_lea.hbm %s2063_s20, 256 }
  0xac   :  { %p1521_p8 = scmp.ne.s32.totalorder %s2063_s20, %s1520_s25  ;;  %p1524_p9 = scmp.lt.u32.totalorder %s1520_s25, %s2063_s20 }
  0xae   :  { %p1526_p10 = pnand %p1524_p9, %p1521_p8 }
  0xb0   :  { %1529 = shalt.err (!%p1526_p10)
}
  0xb1   :  { %s1530_s16 = scalar_lea.vmem %s151_s6, 256  ;;  %p1535_p12 = scmp.lt.s32.totalorder %s151_s6, %s151_s6 }
  0xb2   :  { %p1531_p11 = scmp.ne.s32.totalorder %s151_s6, %s1530_s16  ;;  %p1536_p13 = scmp.lt.s32.totalorder %s1530_s16, %s1530_s16 }
  0xb4   :  { %p1537_p0 = por %p1536_p13, %p1535_p12 }
  0xb6   :  { %p1538_p1 = pnand %p1537_p0, %p1531_p11 }
  0xb8   :  { %1541 = shalt.err (!%p1538_p1)
}
  0xb9   :  { %156 = dma.hbm_to_vmem [thread:$0]  %s2063_s20, 256, %s151_s6, [#allocation17], %s1602_s30, %s1602_s30, %s1603_s26  }
  0xba   :  { %s1542_s24 = scalar_lea.hbm %s2064_s21, 256 }
  0xbb   :  { %p1543_p2 = scmp.ne.s32.totalorder %s2064_s21, %s1542_s24  ;;  %p1546_p3 = scmp.lt.u32.totalorder %s1542_s24, %s2064_s21 }
  0xbd   :  { %p1548_p4 = pnand %p1546_p3, %p1543_p2 }
  0xbf   :  { %1551 = shalt.err (!%p1548_p4)
}
  0xc0   :  { %s1552_s2 = scalar_lea.vmem %s1841_s29, 256  ;;  %p1557_p6 = scmp.lt.s32.totalorder %s1841_s29, %s1841_s29 }
  0xc1   :  { %p1553_p5 = scmp.ne.s32.totalorder %s1841_s29, %s1552_s2  ;;  %p1558_p7 = scmp.lt.s32.totalorder %s1552_s2, %s1552_s2 }
  0xc3   :  { %p1559_p8 = por %p1558_p7, %p1557_p6 }
  0xc5   :  { %p1560_p9 = pnand %p1559_p8, %p1553_p5 }
  0xc7   :  { %1563 = shalt.err (!%p1560_p9)
}
  0xc8   :  { %168 = dma.hbm_to_vmem [thread:$0]  %s2064_s21, 256, %s1841_s29, [#allocation20], %s1602_s30, %s1602_s30, %s1603_s26  }
  0xc9   :  { %1586 = dma.done.wait [#allocation5], 16  }
  0xca   :  { %1587 = vsyncadd [#allocation5], 4294967280 }
  0xcb   :  { %1588 = dma.done.wait [#allocation8], 80  }
  0xcc   :  { %1589 = vsyncadd [#allocation8], 4294967216 }
  0xcd   :  { %1590 = dma.done.wait [#allocation11], 272  }
  0xce   :  { %1591 = vsyncadd [#allocation11], 4294967024 }
  0xcf   :  { %1592 = dma.done.wait [#allocation14], 32  }
  0xd0   :  { %1593 = vsyncadd [#allocation14], 4294967264 }
  0xd1   :  { %1594 = dma.done.wait [#allocation17], 272  }
  0xd2   :  { %1595 = vsyncadd [#allocation17], 4294967024 }
  0xd3   :  { %1596 = dma.done.wait [#allocation20], 256  }
  0xd4   :  { %1597 = vsyncadd [#allocation20], 4294967040  ;;  %v1612_v0 = vmov 0.0   ;;  %s2087_s21 = sld [smem:[#allocation29_spill]]  ;;  %vm1613_vm0 = vmmov 0   ;;  %v1302_v1 = vld [vmem:[%s2051_s8] sm:$0xff]  }
  0xd5   :  { %1179 = vmatprep.subr.bf16.mxu0 %v1612_v0  ;;  %1187 = vmatprep.subr.bf16.mxu1 %v1612_v0  ;;  %s2088_s15 = sld [smem:[#allocation34_spill]]  ;;  %v1304_v3 = vld [vmem:[%s2051_s8 + $0x8] sm:$0xff]   ;;  %s2089_s0 = sld [smem:[#allocation30_spill]]  ;;  %v212_v5 = vld [vmem:[#allocation4] sm:$0x1]  ;;  %vm236_vm1 = vcmask 261120  }
  0xd6   :  { %1183 = vmatprep.mubr.msk.bf16.mxu0 %vm1613_vm0, %v1612_v0  ;;  %1191 = vmatprep.mubr.msk.bf16.mxu1 %vm1613_vm0, %v1612_v0  ;;  %v219_v6 = vpack.c.bf16 %v212_v5, %v212_v5  ;;  %v1306_v8 = vld [vmem:[%s2054_s11] sm:$0xff]   ;;  %v1308_v10 = vld [vmem:[%s2054_s11 + $0x8] sm:$0xff]   ;;  %s2090_s30 = sld [smem:[#allocation35_spill]]  ;;  %v1313_v17 = vld [vmem:[#allocation10 + $0x8] sm:$0xff]   ;;  %vm821_vm3 = vcmask 253952   ;;  %vm872_vm4 = vcmask 57344  }
  0xd7   :  { %1180 = vmatpush3.bf16.msra.mxu0 %v1302_v1  ;;  %v1307_v9 = vld [vmem:[%s2052_s9] sm:$0xff]   ;;  %v1309_v12 = vld [vmem:[%s2052_s9 + $0x8] sm:$0xff]   ;;  %v396_v36 = vld [vmem:[#allocation12] sm:$0x1]  ;;  %vm889_vm5 = vcmask 1043456   ;;  %vm885_vm7 = vcmask 64512  }
  0xd8   :  { %1181 = vmatprep.subr.bf16.mxu0 %v1612_v0  ;;  %v1920_v11 = vld [vmem:[#allocation7] sm:$0x1]  ;;  %v1311_v15 = vld [vmem:[#allocation10] sm:$0xff]   ;;  %v573_v51 = vld [vmem:[#allocation13] sm:$0x1]  ;;  %vm1050_vm8 = vcmask 516096  }
  0xd9   :  { %v335_v13 = vpack.c.bf16 %v1920_v11, %v1920_v11  ;;  %v1314_v18 = vld [vmem:[%s2053_s10] sm:$0xff]   ;;  %v1316_v20 = vld [vmem:[%s2053_s10 + $0x8] sm:$0xff]  }
  0xda   :  { %p206_p10 = scmp.lt.s32.totalorder %s2087_s21, 63  ;;  %v1318_v22 = vld [vmem:[%s2056_s13] sm:$0xff]   ;;  %v1319_v23 = vld [vmem:[%s2056_s13 + $0x8] sm:$0xff]  }
  0xdb   :  { %v1303_v2 = vld [vmem:[%s2088_s15] sm:$0xff]   ;;  %v1305_v4 = vld [vmem:[%s2088_s15 + $0x8] sm:$0xff]   ;;  %1182 = vmatpush3.bf16.msra.mxu0 %v1304_v3  ;;  %s2091_s15 = sld [smem:[#allocation36_spill]] }
  0xdc   :  { %s2096_s21 = smov (!%p206_p10, %s2087_s21), 63  ;;  %1188 = vmatpush3.bf16.msra.mxu1 %v1303_v2  ;;  %1195 = vmatprep.subr.bf16.mxu0 %v1612_v0  ;;  %v1310_v14 = vld [vmem:[%s2090_s30] sm:$0xff]   ;;  %v1312_v16 = vld [vmem:[%s2090_s30 + $0x8] sm:$0xff]  }
  0xdd   :  { %s208_s24 = scalar_lea.vmem %s2089_s0, %s2096_s21  ;;  %1189 = vmatprep.subr.bf16.mxu1 %v1612_v0  ;;  %v1320_v24 = vld [vmem:[%s2061_s18] sm:$0xff]   ;;  %v1321_v25 = vld [vmem:[%s2061_s18 + $0x8] sm:$0xff]  }
  0xde   :  { %v211_v7 = vld [vmem:[%s208_s24] sm:$0x1]  ;;  %1184 = vmatmul.mubr.msk.bf16.vlgmr.msra.gmra.mrb[0].mxu0 %vm236_vm1, %v219_v6 }
  0xdf   :  { %1196 = vmatpush3.bf16.msra.mxu0 %v1306_v8  ;;  %1199 = vmatprep.mubr.msk.bf16.mxu0 %vm1613_vm0, %v1612_v0  ;;  %v699_v8 = vld [vmem:[#allocation16] sm:$0x1] }
  0xe0   :  { %1190 = vmatpush3.bf16.msra.mxu1 %v1305_v4  ;;  %1197 = vmatprep.subr.bf16.mxu0 %v1612_v0 }
  0xe1   :  { %1203 = vmatprep.subr.bf16.mxu1 %v1612_v0  ;;  %v1315_v19 = vld [vmem:[%s2091_s15] sm:$0xff]   ;;  %v1317_v21 = vld [vmem:[%s2091_s15 + $0x8] sm:$0xff]  }
  0xe3   :  { %1192 = vmatmul.mubr.msk.bf16.vlgmr.msra.gmra.mrb[0].mxu1 %vm236_vm1, %v211_v7  ;;  %1198 = vmatpush3.bf16.msra.mxu0 %v1308_v10 }
  0xe4   :  { %1204 = vmatpush3.bf16.msra.mxu1 %v1307_v9  ;;  %1207 = vmatprep.mubr.msk.bf16.mxu1 %vm1613_vm0, %v1612_v0 }
  0xe5   :  { %1205 = vmatprep.subr.bf16.mxu1 %v1612_v0  ;;  %1211 = vmatprep.subr.bf16.mxu0 %v1612_v0 }
  0xe6   :  { %1200 = vmatmul.mubr.msk.bf16.vlgmr.msra.gmra.mrb[4].mxu0 %vm236_vm1, %v335_v13 }
  0xe7   :  { %1212 = vmatpush3.bf16.msra.mxu0 %v1310_v14  ;;  %1215 = vmatprep.mubr.msk.bf16.mxu0 %vm1613_vm0, %v1612_v0 }
  0xe8   :  { %1206 = vmatpush3.bf16.msra.mxu1 %v1309_v12  ;;  %1213 = vmatprep.subr.bf16.mxu0 %v1612_v0 }
  0xe9   :  { %1219 = vmatprep.subr.bf16.mxu1 %v1612_v0 }
  0xeb   :  { %1208 = vmatmul.mubr.msk.bf16.vlgmr.msra.gmra.mrb[4].mxu1 %vm236_vm1, %v219_v6  ;;  %1214 = vmatpush3.bf16.msra.mxu0 %v1312_v16 }
  0xec   :  { %1220 = vmatpush3.bf16.msra.mxu1 %v1311_v15  ;;  %1223 = vmatprep.mubr.msk.bf16.mxu1 %vm1613_vm0, %v1612_v0 }
  0xed   :  { %1221 = vmatprep.subr.bf16.mxu1 %v1612_v0  ;;  %1227 = vmatprep.subr.bf16.mxu0 %v1612_v0 }
  0xee   :  { %1216 = vmatmul.mubr.msk.bf16.vlgmr.msra.gmra.mrb[8].mxu0 %vm236_vm1, %v211_v7 }
  0xef   :  { %1228 = vmatpush3.bf16.msra.mxu0 %v1314_v18  ;;  %1231 = vmatprep.mubr.msk.bf16.mxu0 %vm1613_vm0, %v1612_v0 }
  0xf0   :  { %1222 = vmatpush3.bf16.msra.mxu1 %v1313_v17  ;;  %1229 = vmatprep.subr.bf16.mxu0 %v1612_v0  ;;  %v693_v17 = vld [vmem:[#allocation15] sm:$0x1] }
  0xf1   :  { %1235 = vmatprep.subr.bf16.mxu1 %v1612_v0 }
  0xf3   :  { %1224 = vmatmul.mubr.msk.bf16.vlgmr.msra.gmra.mrb[8].mxu1 %vm236_vm1, %v335_v13  ;;  %1230 = vmatpush3.bf16.msra.mxu0 %v1316_v20 }
  0xf4   :  { %1236 = vmatpush3.bf16.msra.mxu1 %v1315_v19  ;;  %1239 = vmatprep.mubr.msk.bf16.mxu1 %vm1613_vm0, %v1612_v0 }
  0xf5   :  { %1237 = vmatprep.subr.bf16.mxu1 %v1612_v0  ;;  %1243 = vmatprep.subr.bf16.mxu0 %v1612_v0 }
  0xf6   :  { %1232 = vmatmul.mubr.msk.bf16.vlgmr.msra.gmra.mrb[12].mxu0 %vm236_vm1, %v219_v6 }
  0xf7   :  { %1244 = vmatpush3.bf16.msra.mxu0 %v1318_v22  ;;  %1247 = vmatprep.mubr.msk.bf16.mxu0 %vm1613_vm0, %v1612_v0 }
  0xf8   :  { %1238 = vmatpush3.bf16.msra.mxu1 %v1317_v21  ;;  %1245 = vmatprep.subr.bf16.mxu0 %v1612_v0 }
  0xf9   :  { %1251 = vmatprep.subr.bf16.mxu1 %v1612_v0 }
  0xfb   :  { %1240 = vmatmul.mubr.msk.bf16.vlgmr.msra.gmra.mrb[12].mxu1 %vm236_vm1, %v211_v7  ;;  %1246 = vmatpush3.bf16.msra.mxu0 %v1319_v23  ;;  %v1064_v23 = vlaneseq }
  0xfc   :  { %1255 = vmatprep.mubr.msk.bf16.mxu1 %vm1613_vm0, %v1612_v0  ;;  %1259 = vmatprep.subr.bf16.mxu0 %v1612_v0 }
  0xfd   :  { %1252 = vmatpush3.bf16.msra.mxu1 %v1320_v24  ;;  %vm2003_vm2 = vcmp.lt.s32.totalorder %v1064_v23, 32  ;;  %vm1073_vm6 = vcmp.lt.s32.totalorder %v1064_v23, 8  ;;  %vm1066_vm9 = vcmp.lt.s32.totalorder %v1064_v23, 64 }
  0xfe   :  { %1248 = vmatmul.mubr.msk.bf16.vlgmr.msra.gmra.mrb[16].mxu0 %vm236_vm1, %v335_v13  ;;  %1253 = vmatprep.subr.bf16.mxu1 %v1612_v0 }
  0xff   :  { %1261 = vmatprep.mubr.msk.bf16.mxu0 %vm1613_vm0, %v1612_v0 }
 0x101   :  { %1254 = vmatpush3.bf16.msra.mxu1 %v1321_v25 }
 0x102   :  { %1265 = vmatprep.subr.bf16.mxu1 %v1612_v0 }
 0x1b1   :  { %v274_v26 = vpop.f32.mrb[0].mxu0 }
 0x1b2   :  { %v1185_v27 = vpop.f32.mrb[1].mxu0 }
 0x1b3   :  { %v277_v30 = vpop.f32.mrb[2].mxu0 }
 0x1b4   :  { %v1186_v32 = vpop.f32.mrb[3].mxu0 }
 0x1b6   :  { %v329_v28 = vpop.f32.mrb[0].mxu1 }
 0x1b7   :  { %v330_v29 = vadd.f32 %v329_v28, %v274_v26  ;;  %v1193_v31 = vpop.f32.mrb[1].mxu1  ;;  %v819_v28 = vld [vmem:[%s2062_s19] sm:$0x1] }
 0x1b8   :  { %v332_v33 = vpop.f32.mrb[2].mxu1 }
 0x1b9   :  { %v1194_v34 = vpop.f32.mrb[3].mxu1  ;;  %v389_v35 = vpop.f32.mrb[4].mxu0  ;;  %v214_v33 = vld [vmem:[#allocation9] sm:$0xf] }
 0x1ba   :  { %v395_v37 = vadd.f32 %v389_v35, %v330_v29  ;;  %v1201_v38 = vpop.f32.mrb[5].mxu0  ;;  %v830_v34 = vsel %vm236_vm1, %v214_v33, 0 }
 0x1bb   :  { %v392_v40 = vpop.f32.mrb[6].mxu0  ;;  %1260 = vmatpush3.bf16.xpose.msra.mxu0 %v830_v34 }
 0x1bc   :  { %v397_v42 = vadd.f32 %v396_v36, %v395_v37  ;;  %v1202_v43 = vpop.f32.mrb[7].mxu0  ;;  %1271 = vmatprep.subr.bf16.mxu0 %v1612_v0 }
 0x1be   :  { %v458_v39 = vpop.f32.mrb[4].mxu1  ;;  %v1108_v46 = vmul.f32 -1.442695, %v397_v42 }
 0x1bf   :  { %v1209_v41 = vpop.f32.mrb[5].mxu1 }
 0x1c0   :  { %v461_v44 = vpop.f32.mrb[6].mxu1  ;;  %1326 = vpow2.f32 %v1108_v46 }
 0x1c1   :  { %v1210_v45 = vpop.f32.mrb[7].mxu1  ;;  %v510_v47 = vpop.f32.mrb[8].mxu0 }
 0x1c2   :  { %v511_v48 = vadd.f32 %v510_v47, %v458_v39  ;;  %v1217_v49 = vpop.f32.mrb[9].mxu0 }
 0x1c3   :  { %v513_v52 = vpop.f32.mrb[10].mxu0 }
 0x1c4   :  { %v1218_v55 = vpop.f32.mrb[11].mxu0  ;;  %v890_v52 = vsel %vm889_vm5, %v214_v33, 0 }
 0x1c6   :  { %v566_v50 = vpop.f32.mrb[8].mxu1 }
 0x1c7   :  { %v1225_v53 = vpop.f32.mrb[9].mxu1  ;;  %v572_v54 = vadd.f32 %v566_v50, %v511_v48 }
 0x1c8   :  { %v569_v56 = vpop.f32.mrb[10].mxu1  ;;  %v1324_v53 = vld [vmem:[#allocation19] sm:$0xff]  }
 0x1c9   :  { %v1226_v57 = vpop.f32.mrb[11].mxu1  ;;  %v574_v58 = vadd.f32 %v573_v51, %v572_v54  ;;  %v635_v60 = vpop.f32.mrb[12].mxu0 }
 0x1ca   :  { %v1327_v61 = vpop.eup %1326  ;;  %v1233_v62 = vpop.f32.mrb[13].mxu0  ;;  %v1322_v57 = vld [vmem:[#allocation18] sm:$0xff]  }
 0x1cb   :  { %v1118_v59 = vmul.f32 -1.442695, %v574_v58  ;;  %v401_v1 = vadd.f32 1.0, %v1327_v61  ;;  %v638_v2 = vpop.f32.mrb[14].mxu0 }
 0x1cc   :  { %v1234_v5 = vpop.f32.mrb[15].mxu0 }
 0x1cd   :  { %1328 = vpow2.f32 %v1118_v59  ;;  %v1323_v59 = vld [vmem:[#allocation18 + $0x8] sm:$0xff]  }
 0x1ce   :  { %v687_v63 = vpop.f32.mrb[12].mxu1  ;;  %1330 = vrcp.f32 %v401_v1 }
 0x1cf   :  { %v688_v3 = vadd.f32 %v687_v63, %v635_v60  ;;  %v1241_v4 = vpop.f32.mrb[13].mxu1  ;;  %v1325_v60 = vld [vmem:[#allocation19 + $0x8] sm:$0xff]  }
 0x1d0   :  { %v690_v6 = vpop.f32.mrb[14].mxu1 }
 0x1d1   :  { %v1242_v7 = vpop.f32.mrb[15].mxu1  ;;  %v746_v9 = vpop.f32.mrb[16].mxu0  ;;  %v694_v19 = vadd.f32 %v693_v17, %v688_v3 }
 0x1d2   :  { %v1249_v10 = vpop.f32.mrb[17].mxu0  ;;  %v747_v14 = vadd.f32 %v746_v9, %v699_v8  ;;  %v1048_v7 = vld [vmem:[%s2065_s22] sm:$0x1]  ;;  %s1614_s22 = smov [#allocation21]  }
 0x1d3   :  { %v749_v12 = vpop.f32.mrb[18].mxu0  ;;  %s1082_s20 = sshll.u32 %s1614_s22, 4  ;;  %s1083_s20 = int_to_ptr.vmem [resolvable:$true] %s1082_s20 }
 0x1d4   :  { %v1250_v15 = vpop.f32.mrb[19].mxu0  ;;  %s1564_s6 = scalar_lea.vmem %s1083_s20, 64  ;;  %p1569_p12 = scmp.lt.s32.totalorder %s1083_s20, %s1083_s20 }
 0x1d5   :  { %p1565_p11 = scmp.ne.s32.totalorder %s1083_s20, %s1564_s6  ;;  %p1570_p13 = scmp.lt.s32.totalorder %s1564_s6, %s1564_s6 }
 0x1d7   :  { %v1329_v13 = vpop.eup %1328  ;;  %p1571_p0 = por %p1570_p13, %p1569_p12 }
 0x1d8   :  { %v578_v16 = vadd.f32 1.0, %v1329_v13  ;;  %v1331_v18 = vpop.eup %1330 }
 0x1d9   :  { %v752_v20 = vmul.f32 %v1331_v18, %v747_v14  ;;  %p1572_p1 = pnand %p1571_p0, %p1565_p11 }
 0x1da   :  { %1332 = vrcp.f32 %v578_v16 }
 0x1db   :  { %v753_v21 = vadd.f32 %v752_v20, %v694_v19 }
 0x1dd   :  { %1334 = vtanh.f32 %v753_v21 }
 0x1e4   :  { %v1333_v22 = vpop.eup %1332 }
 0x1e5   :  { %v755_v24 = vsub.f32 1.0, %v1333_v22  ;;  %v757_v26 = vmul.f32 %v1333_v22, %v1920_v11 }
 0x1e7   :  { %v1335_v25 = vpop.eup %1334 }
 0x1e8   :  { %v756_v27 = vmul.f32 %v1335_v25, %v755_v24 }
 0x1ea   :  { %v758_v30 = vadd.f32 %v757_v26, %v756_v27 }
 0x1ec   :  { %v759_v31 = vpack.c.bf16 %v758_v30, %v758_v30  ;;  %v820_v32 = vmul.f32 %v819_v28, %v758_v30  ;;  %1072 = vst.msk [vmem:[#allocation21 + $0x2] sm:$0x1] %vm2003_vm2, %v758_v30 }
 0x1ee   :  { %1256 = vmatmul.mubr.msk.bf16.vlgmr.msra.gmra.mrb[16].mxu1 %vm236_vm1, %v759_v31  ;;  %v822_v11 = vsel %vm821_vm3, %v820_v32, 0.0 }
 0x1ef   :  { %823 = vadd.xlane.f32.xlu0 %v822_v11  ;;  %1267 = vmatprep.mubr.msk.bf16.mxu1 %vm1613_vm0, %v1612_v0 }
 0x1f0   :  { %1266 = vmatpush3.bf16.msra.mxu1 %v890_v52 }
 0x1f1   :  { %1279 = vmatprep.subr.bf16.mxu1 %v1612_v0 }
 0x27c   :  { %v824_v40 = vpop.xlane.xlu0 %823 }
 0x2c1   :  { %v813_v35 = vpop.f32.mrb[16].mxu1 }
 0x2c2   :  { %v825_v36 = vpack.c.bf16 %v813_v35, %v813_v35  ;;  %v1257_v37 = vpop.f32.mrb[17].mxu1 }
 0x2c3   :  { %v816_v38 = vpop.f32.mrb[18].mxu1 }
 0x2c4   :  { %v1258_v39 = vpop.f32.mrb[19].mxu1  ;;  %1262 = vmatmul.mubr.msk.bf16.vlgmr.msra.gmra.mrb[20].mxu0 %vm236_vm1, %v825_v36 }
 0x2c5   :  { %1275 = vmatprep.mubr.msk.bf16.mxu0 %vm1613_vm0, %v1612_v0  ;;  %1272 = vmatpush3.bf16.msra.mxu0 %v1324_v53 }
 0x2c6   :  { %1273 = vmatprep.subr.bf16.mxu0 %v1612_v0 }
 0x2c9   :  { %1274 = vmatpush3.bf16.msra.mxu0 %v1325_v60 }
 0x397   :  { %v866_v41 = vpop.f32.mrb[20].mxu0 }
 0x398   :  { %v867_v42 = vadd.f32 %v866_v41, %v824_v40  ;;  %v1263_v43 = vpop.f32.mrb[21].mxu0 }
 0x399   :  { %v869_v44 = vpop.f32.mrb[22].mxu0 }
 0x39a   :  { %v1264_v45 = vpop.f32.mrb[23].mxu0  ;;  %v873_v46 = vsel %vm872_vm4, %v867_v42, -inf }
 0x39b   :  { %874 = vmax.xlane.f32.xlu0 %v873_v46 }
 0x428   :  { %v875_v47 = vpop.xlane.xlu0 %874 }
 0x429   :  { %v876_v48 = vsub.f32 %v867_v42, %v875_v47 }
 0x42b   :  { %v877_v49 = vmul.f32 1.442695, %v876_v48 }
 0x42d   :  { %1336 = vpow2.f32 %v877_v49 }
 0x437   :  { %v1337_v50 = vpop.eup %1336 }
 0x438   :  { %v879_v51 = vsel %vm872_vm4, %v1337_v50, 0.0 }
 0x439   :  { %880 = vadd.xlane.f32.xlu1 %v879_v51 }
 0x4c6   :  { %v881_v54 = vpop.xlane.xlu1 %880 }
 0x4c7   :  { %1338 = vrcp.f32 %v881_v54 }
 0x4d1   :  { %v1339_v55 = vpop.eup %1338 }
 0x4d2   :  { %v883_v56 = vmul.f32 %v1339_v55, %v1337_v50 }
 0x4d4   :  { %v884_v58 = vpack.c.bf16 %v883_v56, %v883_v56  ;;  %1075 = vst.msk [vmem:[#allocation21 + $0x3] sm:$0x1] %vm1073_vm6, %v883_v56 }
 0x4d6   :  { %1268 = vmatmul.mubr.msk.bf16.vlgmr.msra.gmra.mrb[20].mxu1 %vm885_vm7, %v884_v58 }
 0x4d7   :  { %1280 = vmatpush3.bf16.msra.mxu1 %v1322_v57  ;;  %1283 = vmatprep.mubr.msk.bf16.mxu1 %vm1613_vm0, %v1612_v0 }
 0x4d8   :  { %1281 = vmatprep.subr.bf16.mxu1 %v1612_v0 }
 0x4db   :  { %1282 = vmatpush3.bf16.msra.mxu1 %v1323_v59 }
 0x4de   :  { %1284 = vmatmul.mubr.msk.bf16.vlgmr.msra.gmra.mrb[24].mxu1 %vm236_vm1, %v759_v31 }
 0x5a9   :  { %v926_v61 = vpop.f32.mrb[20].mxu1 }
 0x5aa   :  { %v936_v62 = vpack.c.bf16 %v926_v61, %v926_v61  ;;  %1071 = vst.msk [vmem:[#allocation21 + $0x1] sm:$0x1] %vm2003_vm2, %v926_v61  ;;  %v1269_v63 = vpop.f32.mrb[21].mxu1 }
 0x5ab   :  { %v929_v1 = vpop.f32.mrb[22].mxu1 }
 0x5ac   :  { %v1270_v2 = vpop.f32.mrb[23].mxu1  ;;  %1276 = vmatmul.mubr.msk.bf16.vlgmr.msra.gmra.mrb[24].mxu0 %vm236_vm1, %v936_v62 }
 0x5b1   :  { %v1042_v3 = vpop.f32.mrb[24].mxu1 }
 0x5b2   :  { %v1285_v4 = vpop.f32.mrb[25].mxu1 }
 0x5b3   :  { %v1045_v5 = vpop.f32.mrb[26].mxu1 }
 0x5b4   :  { %v1286_v6 = vpop.f32.mrb[27].mxu1 }
 0x67f   :  { %v990_v0 = vpop.f32.mrb[24].mxu0 }
 0x680   :  { %v1043_v8 = vadd.f32 %v1042_v3, %v990_v0  ;;  %v1277_v9 = vpop.f32.mrb[25].mxu0 }
 0x681   :  { %v993_v10 = vpop.f32.mrb[26].mxu0 }
 0x682   :  { %v1049_v12 = vadd.f32 %v1048_v7, %v1043_v8  ;;  %v1278_v13 = vpop.f32.mrb[27].mxu0 }
 0x684   :  { %v1051_v14 = vsel %vm1050_vm8, %v1049_v12, -inf }
 0x685   :  { %1052 = vmax.xlane.f32.xlu1 %v1051_v14 }
 0x712   :  { %v1053_v15 = vpop.xlane.xlu1 %1052 }
 0x713   :  { %v1054_v16 = vsub.f32 %v1049_v12, %v1053_v15 }
 0x715   :  { %v1055_v17 = vmul.f32 1.442695, %v1054_v16 }
 0x717   :  { %1340 = vpow2.f32 %v1055_v17 }
 0x721   :  { %v1341_v18 = vpop.eup %1340 }
 0x722   :  { %v1057_v19 = vsel %vm1050_vm8, %v1341_v18, 0.0 }
 0x723   :  { %1058 = vadd.xlane.f32.xlu0 %v1057_v19 }
 0x7b0   :  { %v1059_v20 = vpop.xlane.xlu0 %1058 }
 0x7b1   :  { %1342 = vlog2.f32 %v1059_v20 }
 0x7bb   :  { %v1343_v21 = vpop.eup %1342 }
 0x7bc   :  { %v1061_v22 = vmul.f32 0.6931472, %v1343_v21 }
 0x7be   :  { %v1062_v24 = vadd.f32 %v1061_v22, %v1053_v15 }
 0x7c0   :  { %v1063_v25 = vsub.f32 %v1049_v12, %v1062_v24 }
 0x7c2   :  { %1068 = vst.msk [vmem:[#allocation21] sm:$0x1] %vm1066_vm9, %v1063_v25 }
 0x7c3   :  { %1575 = shalt.err (!%p1572_p1)
}
 0x7c4   :  { %s2094_s11 = sld [smem:[#allocation37_spill]] }
 0x7ca   :  { %s1576_s21 = scalar_lea.hbm %s2094_s11, 64 }
 0x7cb   :  { %p1577_p2 = scmp.ne.s32.totalorder %s2094_s11, %s1576_s21  ;;  %p1580_p3 = scmp.lt.u32.totalorder %s1576_s21, %s2094_s11 }
 0x7cd   :  { %p1582_p4 = pnand %p1580_p3, %p1577_p2 }
 0x7cf   :  { %1585 = shalt.err (!%p1582_p4)
}
 0x7d0   :  { %1085 = dma.vmem_to_hbm [thread:$0]  %s1083_s20, 64, %s2094_s11, [#allocation6]  }
 0x7d1   :  { %1598 = dma.done.wait [#allocation6], 64  }
 0x7d2   :  { %1599 = vsyncadd [#allocation6], 4294967232 }
 0x7d3   :  { %1089 = vsyncpa [#allocation5], 1 }
 0x7d4   :  { %1090 = vsyncpa [#allocation8], 1 }
 0x7d5   :  { %1091 = vsyncpa [#allocation11], 1 }
 0x7d6   :  { %1092 = vsyncpa [#allocation14], 1 }
 0x7d7   :  { %1093 = vsyncpa [#allocation17], 1 }
 0x7d8   :  { %1094 = vsyncpa [#allocation20], 1 }
 0x7d9   :  { %1095 = vsyncpa [#allocation6], 1 }

</bundles_post_ra>
